<compile_context>
chip_gen: v5e
topology: v5e:2x2
jax: 0.10.0
libtpu: 0.0.40
codegen_flags: <defaults>
</compile_context>

<pallas_src>
import math
import jax
import jax.numpy as jnp
from jax.experimental import pallas as pl
from jax.experimental.pallas import tpu as pltpu

BN_EPS = 1e-5


def _mlp_kernel(xa_ref, xb_ref,
                w1a_ref, w1b_ref, b1_ref,
                w2_ref, b2_ref,
                w3_ref, b3_ref,
                o_ref):
    """One batch tile: (Linear+ReLU, BN folded) x2 -> Linear -> tanh."""
    wdt = w2_ref.dtype  # MXU operand dtype (f32 or bf16)

    # Layer 1: split contraction replaces the wrapper-side concat.
    h = (jnp.dot(xa_ref[...], w1a_ref[...], preferred_element_type=jnp.float32)
         + jnp.dot(xb_ref[...], w1b_ref[...], preferred_element_type=jnp.float32)
         + b1_ref[...])
    h = jnp.maximum(h, 0.0)                       # f32 epilogue (v5e-safe)

    # Layer 2: BN1 already folded into w2/b2.
    h = jnp.dot(h.astype(wdt), w2_ref[...],
                preferred_element_type=jnp.float32) + b2_ref[...]
    h = jnp.maximum(h, 0.0)

    # Output layer: BN2 folded into w3/b3, then tanh.
    h = jnp.dot(h.astype(wdt), w3_ref[...],
                preferred_element_type=jnp.float32) + b3_ref[...]
    o_ref[...] = jnp.tanh(h).astype(o_ref.dtype)


def _xavier_uniform(key, fan_out, fan_in, gain=0.01, dtype=jnp.float32):
    # Matches torch.nn.init.xavier_uniform_(weight, gain) for weight shape (out, in).
    bound = gain * math.sqrt(6.0 / (fan_in + fan_out))
    return jax.random.uniform(key, (fan_out, fan_in), dtype=dtype,
                              minval=-bound, maxval=bound)


def init_params(key, profile_size, feature_size, hidden_sizes=(128, 64)):
    combined = feature_size + 7
    dims = [combined, hidden_sizes[0], hidden_sizes[1], profile_size]
    keys = jax.random.split(key, 3)
    params = {}
    for i in range(3):
        fan_in, fan_out = dims[i], dims[i + 1]
        # weights stored pre-transposed as (in, out) for x @ W
        params[f"w{i+1}"] = _xavier_uniform(keys[i], fan_out, fan_in).T
        params[f"b{i+1}"] = jnp.zeros((1, fan_out), jnp.float32)
    for i, h in enumerate(hidden_sizes, start=1):
        params[f"gamma{i}"] = jnp.ones((1, h), jnp.float32)
        params[f"beta{i}"] = jnp.zeros((1, h), jnp.float32)
        params[f"rmean{i}"] = jnp.zeros((1, h), jnp.float32)
        params[f"rvar{i}"] = jnp.ones((1, h), jnp.float32)
    return params


def profile_corrector_forward(features, chapman_params, params, profile_size,
                              *, block_b=512, matmul_dtype=jnp.float32):
    """Eval-mode forward. `matmul_dtype=jnp.bfloat16` halves HBM bytes for the
    MXU operands (recommended on v6e/v7x); epilogue math stays f32."""
    B, F = features.shape
    C = chapman_params.shape[1]

    # ---- trace-time BatchNorm folding (eval mode, f32) -----------------------
    scale1 = params["gamma1"] * jax.lax.rsqrt(params["rvar1"] + BN_EPS)   # (1, H1)
    shift1 = params["beta1"] - params["rmean1"] * scale1
    scale2 = params["gamma2"] * jax.lax.rsqrt(params["rvar2"] + BN_EPS)   # (1, H2)
    shift2 = params["beta2"] - params["rmean2"] * scale2

    w2f = params["w2"] * scale1.T                       # (H1, H2)
    b2f = params["b2"] + shift1 @ params["w2"]          # (1, H2)
    w3f = params["w3"] * scale2.T                       # (H2, P)
    b3f = params["b3"] + shift2 @ params["w3"]          # (1, P)

    # Split W1 so the kernel consumes features / chapman_params without a concat.
    w1a = params["w1"][:F]                              # (F, H1)
    w1b = params["w1"][F:]                              # (C, H1)
    b1 = params["b1"].astype(jnp.float32)
    b2f = b2f.astype(jnp.float32)
    b3f = b3f.astype(jnp.float32)

    # Narrow dtype only for MXU operands (x and W); accumulation stays f32.
    xa = features.astype(matmul_dtype)
    xb = chapman_params.astype(matmul_dtype)
    w1a = w1a.astype(matmul_dtype)
    w1b = w1b.astype(matmul_dtype)
    w2f = w2f.astype(matmul_dtype)
    w3f = w3f.astype(matmul_dtype)

    # ---- batch grid: weights resident, x/out pipelined -----------------------
    TB = B if B <= block_b else block_b
    grid = (pl.cdiv(B, TB),)

    row = lambda i: (i, 0)     # batch-tiled arrays
    keep = lambda i: (0, 0)    # resident weights / biases

    out = pl.pallas_call(
        _mlp_kernel,
        out_shape=jax.ShapeDtypeStruct((B, profile_size), jnp.float32),
        grid=grid,
        in_specs=[
            pl.BlockSpec((TB, F), row),
            pl.BlockSpec((TB, C), row),
            pl.BlockSpec(w1a.shape, keep),
            pl.BlockSpec(w1b.shape, keep),
            pl.BlockSpec(b1.shape, keep),
            pl.BlockSpec(w2f.shape, keep),
            pl.BlockSpec(b2f.shape, keep),
            pl.BlockSpec(w3f.shape, keep),
            pl.BlockSpec(b3f.shape, keep),
        ],
        out_specs=pl.BlockSpec((TB, profile_size), row),
        compiler_params=pltpu.CompilerParams(
            dimension_semantics=("parallel",)),   # v7x: 2 TCs split the batch
    )(xa, xb, w1a, w1b, b1, w2f, b2f, w3f, b3f)
    return out


def reference_forward(features, chapman_params, params):
    # Plain-JAX reference (unfolded eval-mode math) for correctness checking.
    x = jnp.concatenate([features, chapman_params], axis=1).astype(jnp.float32)
    h = jnp.maximum(x @ params["w1"] + params["b1"], 0.0)
    h = (h - params["rmean1"]) / jnp.sqrt(params["rvar1"] + BN_EPS) * params["gamma1"] + params["beta1"]
    h = jnp.maximum(h @ params["w2"] + params["b2"], 0.0)
    h = (h - params["rmean2"]) / jnp.sqrt(params["rvar2"] + BN_EPS) * params["gamma2"] + params["beta2"]
    return jnp.tanh(h @ params["w3"] + params["b3"])


if __name__ == "__main__":
    profile_size = 16
    feature_size = 32

    key = jax.random.PRNGKey(0)
    k_feat, k_chap, k_params = jax.random.split(key, 3)
    params = init_params(k_params, profile_size, feature_size)

    # ---- test 1: f32, single batch tile --------------------------------------
    batch = 8
    features = jax.random.normal(k_feat, (batch, feature_size), jnp.float32)
    chapman = jax.random.normal(k_chap, (batch, 7), jnp.float32)

    out = profile_corrector_forward(features, chapman, params, profile_size)
    out = jax.block_until_ready(out)
    ref = reference_forward(features, chapman, params)
    assert out.shape == (batch, profile_size)
    assert jnp.allclose(out, ref, atol=1e-5, rtol=1e-5)

    # ---- test 2: f32, multi-step batch grid with a partial last tile ---------
    batch2 = 40
    features2 = jax.random.normal(k_feat, (batch2, feature_size), jnp.float32)
    chapman2 = jax.random.normal(k_chap, (batch2, 7), jnp.float32)

    out2 = profile_corrector_forward(features2, chapman2, params, profile_size,
                                     block_b=16)
    out2 = jax.block_until_ready(out2)
    ref2 = reference_forward(features2, chapman2, params)
    assert out2.shape == (batch2, profile_size)
    assert jnp.allclose(out2, ref2, atol=1e-5, rtol=1e-5)

    # ---- test 3: bf16 MXU operands (v6e/v7x roofline option), f32 epilogue ---
    out3 = profile_corrector_forward(features2, chapman2, params, profile_size,
                                     block_b=16, matmul_dtype=jnp.bfloat16)
    out3 = jax.block_until_ready(out3)
    assert out3.shape == (batch2, profile_size)
    assert jnp.allclose(out3, ref2, atol=1e-3)

    print("KERNEL_OK")
</pallas_src>

<mosaic_0001>
module attributes {stable_mosaic.version = 11 : i64} {
  func.func @_mlp_kernel(%arg0: i32, %arg1: memref<8x32xf32, #tpu.memory_space<vmem>>, %arg2: memref<8x7xf32, #tpu.memory_space<vmem>>, %arg3: memref<32x128xf32, #tpu.memory_space<vmem>>, %arg4: memref<7x128xf32, #tpu.memory_space<vmem>>, %arg5: memref<1x128xf32, #tpu.memory_space<vmem>>, %arg6: memref<128x64xf32, #tpu.memory_space<vmem>>, %arg7: memref<1x64xf32, #tpu.memory_space<vmem>>, %arg8: memref<64x16xf32, #tpu.memory_space<vmem>>, %arg9: memref<1x16xf32, #tpu.memory_space<vmem>>, %arg10: memref<8x16xf32, #tpu.memory_space<vmem>>) attributes {dimension_semantics = [#tpu.dimension_semantics<parallel>], iteration_bounds = array<i64: 1>, scalar_prefetch = 0 : i64, scratch_operands = 0 : i64, tpu.core_type = #tpu.core_type<tc>, window_params = [{transform_indices = @transform_0, window_bounds = array<i64: 8, 32>}, {transform_indices = @transform_1, window_bounds = array<i64: 8, 7>}, {pipeline_mode = #tpu.pipeline_mode<synchronous>, transform_indices = @transform_2, window_bounds = array<i64: 32, 128>}, {pipeline_mode = #tpu.pipeline_mode<synchronous>, transform_indices = @transform_3, window_bounds = array<i64: 7, 128>}, {pipeline_mode = #tpu.pipeline_mode<synchronous>, transform_indices = @transform_4, window_bounds = array<i64: 1, 128>}, {pipeline_mode = #tpu.pipeline_mode<synchronous>, transform_indices = @transform_5, window_bounds = array<i64: 128, 64>}, {pipeline_mode = #tpu.pipeline_mode<synchronous>, transform_indices = @transform_6, window_bounds = array<i64: 1, 64>}, {pipeline_mode = #tpu.pipeline_mode<synchronous>, transform_indices = @transform_7, window_bounds = array<i64: 64, 16>}, {pipeline_mode = #tpu.pipeline_mode<synchronous>, transform_indices = @transform_8, window_bounds = array<i64: 1, 16>}, {transform_indices = @transform_9, window_bounds = array<i64: 8, 16>}]} {
    %c0 = arith.constant 0 : index
    %c0_0 = arith.constant 0 : index
    %0 = vector.load %arg1[%c0, %c0_0] : memref<8x32xf32, #tpu.memory_space<vmem>>, vector<8x32xf32>
    %c0_1 = arith.constant 0 : index
    %c0_2 = arith.constant 0 : index
    %1 = vector.load %arg3[%c0_1, %c0_2] : memref<32x128xf32, #tpu.memory_space<vmem>>, vector<32x128xf32>
    %cst = arith.constant dense<0.000000e+00> : vector<8x128xf32>
    %2 = tpu.matmul %0, %1, %cst {dimension_numbers = #tpu.dot_dimension_numbers<[1], [0], [0], [1], [0, 0, 1, 1], [], []>} : vector<8x32xf32>, vector<32x128xf32>, vector<8x128xf32> -> vector<8x128xf32>
    %c0_3 = arith.constant 0 : index
    %c0_4 = arith.constant 0 : index
    %3 = vector.load %arg2[%c0_3, %c0_4] : memref<8x7xf32, #tpu.memory_space<vmem>>, vector<8x7xf32>
    %c0_5 = arith.constant 0 : index
    %c0_6 = arith.constant 0 : index
    %4 = vector.load %arg4[%c0_5, %c0_6] : memref<7x128xf32, #tpu.memory_space<vmem>>, vector<7x128xf32>
    %cst_7 = arith.constant dense<0.000000e+00> : vector<8x128xf32>
    %5 = tpu.matmul %3, %4, %cst_7 {dimension_numbers = #tpu.dot_dimension_numbers<[1], [0], [0], [1], [0, 0, 1, 1], [], []>} : vector<8x7xf32>, vector<7x128xf32>, vector<8x128xf32> -> vector<8x128xf32>
    %6 = arith.addf %2, %5 : vector<8x128xf32>
    %c0_8 = arith.constant 0 : index
    %c0_9 = arith.constant 0 : index
    %7 = vector.load %arg5[%c0_8, %c0_9] : memref<1x128xf32, #tpu.memory_space<vmem>>, vector<1x128xf32>
    %8 = vector.broadcast %7 : vector<1x128xf32> to vector<8x128xf32>
    %9 = arith.addf %6, %8 : vector<8x128xf32>
    %cst_10 = arith.constant 0.000000e+00 : f32
    %10 = vector.broadcast %cst_10 : f32 to vector<8x128xf32>
    %11 = arith.maximumf %9, %10 : vector<8x128xf32>
    %c0_11 = arith.constant 0 : index
    %c0_12 = arith.constant 0 : index
    %12 = vector.load %arg6[%c0_11, %c0_12] : memref<128x64xf32, #tpu.memory_space<vmem>>, vector<128x64xf32>
    %cst_13 = arith.constant dense<0.000000e+00> : vector<8x64xf32>
    %13 = tpu.matmul %11, %12, %cst_13 {dimension_numbers = #tpu.dot_dimension_numbers<[1], [0], [0], [1], [0, 0, 1, 1], [], []>} : vector<8x128xf32>, vector<128x64xf32>, vector<8x64xf32> -> vector<8x64xf32>
    %c0_14 = arith.constant 0 : index
    %c0_15 = arith.constant 0 : index
    %14 = vector.load %arg7[%c0_14, %c0_15] : memref<1x64xf32, #tpu.memory_space<vmem>>, vector<1x64xf32>
    %15 = vector.broadcast %14 : vector<1x64xf32> to vector<8x64xf32>
    %16 = arith.addf %13, %15 : vector<8x64xf32>
    %cst_16 = arith.constant 0.000000e+00 : f32
    %17 = vector.broadcast %cst_16 : f32 to vector<8x64xf32>
    %18 = arith.maximumf %16, %17 : vector<8x64xf32>
    %c0_17 = arith.constant 0 : index
    %c0_18 = arith.constant 0 : index
    %19 = vector.load %arg8[%c0_17, %c0_18] : memref<64x16xf32, #tpu.memory_space<vmem>>, vector<64x16xf32>
    %cst_19 = arith.constant dense<0.000000e+00> : vector<8x16xf32>
    %20 = tpu.matmul %18, %19, %cst_19 {dimension_numbers = #tpu.dot_dimension_numbers<[1], [0], [0], [1], [0, 0, 1, 1], [], []>} : vector<8x64xf32>, vector<64x16xf32>, vector<8x16xf32> -> vector<8x16xf32>
    %c0_20 = arith.constant 0 : index
    %c0_21 = arith.constant 0 : index
    %21 = vector.load %arg9[%c0_20, %c0_21] : memref<1x16xf32, #tpu.memory_space<vmem>>, vector<1x16xf32>
    %22 = vector.broadcast %21 : vector<1x16xf32> to vector<8x16xf32>
    %23 = arith.addf %20, %22 : vector<8x16xf32>
    %24 = math.tanh %23 : vector<8x16xf32>
    %c0_22 = arith.constant 0 : index
    %c0_23 = arith.constant 0 : index
    %25 = vector.load %arg10[%c0_22, %c0_23] : memref<8x16xf32, #tpu.memory_space<vmem>>, vector<8x16xf32>
    tpu.vector_store %arg10[%c0_22, %c0_23], %24 {strides = array<i32>} : memref<8x16xf32, #tpu.memory_space<vmem>>, vector<8x16xf32>,
    return
  }
  func.func @transform_0(%arg0: i32) -> (i32, i32) {
    %c0_i32 = arith.constant 0 : i32
    %c0_i32_0 = arith.constant 0 : i32
    return %arg0, %c0_i32 : i32, i32
  }
  func.func @transform_1(%arg0: i32) -> (i32, i32) {
    %c0_i32 = arith.constant 0 : i32
    %c0_i32_0 = arith.constant 0 : i32
    return %arg0, %c0_i32 : i32, i32
  }
  func.func @transform_2(%arg0: i32) -> (i32, i32) {
    %c0_i32 = arith.constant 0 : i32
    %c0_i32_0 = arith.constant 0 : i32
    %c0_i32_1 = arith.constant 0 : i32
    return %c0_i32, %c0_i32_0 : i32, i32
  }
  func.func @transform_3(%arg0: i32) -> (i32, i32) {
    %c0_i32 = arith.constant 0 : i32
    %c0_i32_0 = arith.constant 0 : i32
    %c0_i32_1 = arith.constant 0 : i32
    return %c0_i32, %c0_i32_0 : i32, i32
  }
  func.func @transform_4(%arg0: i32) -> (i32, i32) {
    %c0_i32 = arith.constant 0 : i32
    %c0_i32_0 = arith.constant 0 : i32
    %c0_i32_1 = arith.constant 0 : i32
    return %c0_i32, %c0_i32_0 : i32, i32
  }
  func.func @transform_5(%arg0: i32) -> (i32, i32) {
    %c0_i32 = arith.constant 0 : i32
    %c0_i32_0 = arith.constant 0 : i32
    %c0_i32_1 = arith.constant 0 : i32
    return %c0_i32, %c0_i32_0 : i32, i32
  }
  func.func @transform_6(%arg0: i32) -> (i32, i32) {
    %c0_i32 = arith.constant 0 : i32
    %c0_i32_0 = arith.constant 0 : i32
    %c0_i32_1 = arith.constant 0 : i32
    return %c0_i32, %c0_i32_0 : i32, i32
  }
  func.func @transform_7(%arg0: i32) -> (i32, i32) {
    %c0_i32 = arith.constant 0 : i32
    %c0_i32_0 = arith.constant 0 : i32
    %c0_i32_1 = arith.constant 0 : i32
    return %c0_i32, %c0_i32_0 : i32, i32
  }
  func.func @transform_8(%arg0: i32) -> (i32, i32) {
    %c0_i32 = arith.constant 0 : i32
    %c0_i32_0 = arith.constant 0 : i32
    %c0_i32_1 = arith.constant 0 : i32
    return %c0_i32, %c0_i32_0 : i32, i32
  }
  func.func @transform_9(%arg0: i32) -> (i32, i32) {
    %c0_i32 = arith.constant 0 : i32
    %c0_i32_0 = arith.constant 0 : i32
    return %arg0, %c0_i32 : i32, i32
  }
}

</mosaic_0001>

<bundles_post_ra>
// kernel: tpu_custom_call.1
= control target key start
LH: loop header
LB: loop body
LE: loop exit
PB: predicated region body
PF: predicated region fallthrough
CT: control target
= control target key end

     0   :  { %vm44_vm0 = vcmask 1046528   ;;  %vm40_vm1 = vcmask 56320   ;;  %vm68_vm2 = vcmask 261120   ;;  %s386_s0 = inlined_call_operand.vmem [shape: f32[8,32], index: 0, kind: input, shape index: {}]   ;;  %s387_s1 = inlined_call_operand.vmem [shape: f32[8,7], index: 1, kind: input, shape index: {}]   ;;  %s388_s2 = inlined_call_operand.vmem [shape: f32[32,128], index: 2, kind: input, shape index: {}]   ;;  %s389_s3 = inlined_call_operand.vmem [shape: f32[7,128], index: 3, kind: input, shape index: {}]   ;;  %s390_s4 = inlined_call_operand.vmem [shape: f32[1,128], index: 4, kind: input, shape index: {}]   ;;  %s391_s5 = inlined_call_operand.vmem [shape: f32[128,64], index: 5, kind: input, shape index: {}]   ;;  %s392_s6 = inlined_call_operand.vmem [shape: f32[1,64], index: 6, kind: input, shape index: {}]   ;;  %s393_s7 = inlined_call_operand.vmem [shape: f32[64,16], index: 7, kind: input, shape index: {}]   ;;  %s394_s8 = inlined_call_operand.vmem [shape: f32[1,16], index: 8, kind: input, shape index: {}]   ;;  %s395_s9 = inlined_call_operand.hbm [shape: f32[8,16], index: 9, kind: output, shape index: {}]  }
   0x1   :  { %v37_v0 = vld [vmem:[%s388_s2 + $0x18] sm:$0xff]  ;;  %v36_v1 = vld [vmem:[%s388_s2 + $0x10] sm:$0xff]  ;;  %v39_v2 = vld [vmem:[%s389_s3] sm:$0x7f] }
   0x2   :  { %84 = vmatpush.msra.mxu1 %v37_v0  ;;  %v38_v3 = vld [vmem:[%s387_s1] sm:$0xff]  ;;  %v35_v4 = vld [vmem:[%s388_s2 + $0x8] sm:$0xff]  ;;  %194 = vmatpush.msk.msra.mxu0 %vm44_vm0, %v39_v2  ;;  %v113_v5 = vld [vmem:[%s391_s5 + $0x78] sm:$0xff] }
   0x3   :  { %195 = vmatmul.msk.f32.vlgmr.msra.gmra.mxu0 %vm40_vm1, %v38_v3  ;;  %v112_v6 = vld [vmem:[%s391_s5 + $0x70] sm:$0xff]  ;;  %v34_v7 = vld [vmem:[%s388_s2] sm:$0xff]  ;;  %118 = vmatpush.msra.mxu2 %v113_v5  ;;  %v111_v9 = vld [vmem:[%s391_s5 + $0x68] sm:$0xff] }
   0x4   :  { %85 = vmatpush.msra.mxu1 %v36_v1  ;;  %v33_v8 = vld [vmem:[%s386_s0] sm:$0xff] }
   0x5   :  { %119 = vmatpush.msra.mxu2 %v112_v6  ;;  %v110_v10 = vld [vmem:[%s391_s5 + $0x60] sm:$0xff] }
   0x6   :  { %86 = vmatpush.msra.mxu1 %v35_v4 }
   0x8   :  { %87 = vmatpush.msra.mxu1 %v34_v7 }
   0x9   :  { %14 = vsyncpa [#allocation3], 0  ;;  %196 = vmatmul.msk.f32.vlgmr.msra.gmra.mxu1 %vm68_vm2, %v33_v8  ;;  %120 = vmatpush.msra.mxu2 %v111_v9  ;;  %v109_v11 = vld [vmem:[%s391_s5 + $0x58] sm:$0xff]  ;;  %v108_v12 = vld [vmem:[%s391_s5 + $0x50] sm:$0xff]  ;;  %vm151_vm3 = vcmask 523264   ;;  %s230_s1 = smov [#allocation2]  }
   0xa   :  { %v107_v13 = vld [vmem:[%s391_s5 + $0x48] sm:$0xff]  ;;  %v106_v14 = vld [vmem:[%s391_s5 + $0x40] sm:$0xff]  ;;  %v105_v15 = vld [vmem:[%s391_s5 + $0x38] sm:$0xff]  ;;  %s183_s24 = sshll.u32 %s230_s1, 4  ;;  %s185_s26 = sshll.u32 %s395_s9, 4  ;;  %vm176_vm4 = vcmask 130048   ;;  %s184_s24 = int_to_ptr.vmem [resolvable:$true] %s183_s24  ;;  %s186_s26 = int_to_ptr.hbm [resolvable:$true] %s185_s26 }
   0xb   :  { %121 = vmatpush.msra.mxu2 %v110_v10  ;;  %v104_v16 = vld [vmem:[%s391_s5 + $0x30] sm:$0xff]  ;;  %v103_v17 = vld [vmem:[%s391_s5 + $0x28] sm:$0xff]  ;;  %v102_v18 = vld [vmem:[%s391_s5 + $0x20] sm:$0xff] }
   0xc   :  { %v101_v19 = vld [vmem:[%s391_s5 + $0x18] sm:$0xff]  ;;  %v100_v20 = vld [vmem:[%s391_s5 + $0x10] sm:$0xff]  ;;  %v99_v21 = vld [vmem:[%s391_s5 + $0x8] sm:$0xff] }
   0xd   :  { %122 = vmatpush.msra.mxu2 %v109_v11  ;;  %v98_v22 = vld [vmem:[%s391_s5] sm:$0xff]  ;;  %v146_v23 = vld [vmem:[%s393_s7 + $0x38] sm:$0xff]  ;;  %v145_v24 = vld [vmem:[%s393_s7 + $0x30] sm:$0xff] }
   0xe   :  { %163 = vmatpush.msra.mxu3 %v146_v23  ;;  %v144_v25 = vld [vmem:[%s393_s7 + $0x28] sm:$0xff]  ;;  %v143_v26 = vld [vmem:[%s393_s7 + $0x20] sm:$0xff]  ;;  %v142_v27 = vld [vmem:[%s393_s7 + $0x18] sm:$0xff] }
   0xf   :  { %123 = vmatpush.msra.mxu2 %v108_v12  ;;  %v199_v29 = vld [vmem:[%s390_s4] ss:$0 sm:$0xff]  ;;  %v141_v34 = vld [vmem:[%s393_s7 + $0x10] sm:$0xff]  ;;  %v140_v35 = vld [vmem:[%s393_s7 + $0x8] sm:$0xff] }
  0x10   :  { %164 = vmatpush.msra.mxu3 %v145_v24  ;;  %v139_v36 = vld [vmem:[%s393_s7] sm:$0xff] }
  0x11   :  { %124 = vmatpush.msra.mxu2 %v107_v13  ;;  %v200_v37 = vld [vmem:[%s392_s6] ss:$0 sm:$0xff] }
  0x12   :  { %165 = vmatpush.msra.mxu3 %v144_v25  ;;  %v201_v41 = vld [vmem:[%s394_s8] ss:$0 sm:$0xff] }
  0x13   :  { %125 = vmatpush.msra.mxu2 %v106_v14 }
  0x14   :  { %166 = vmatpush.msra.mxu3 %v143_v26 }
  0x15   :  { %126 = vmatpush.msra.mxu2 %v105_v15 }
  0x16   :  { %167 = vmatpush.msra.mxu3 %v142_v27 }
  0x17   :  { %127 = vmatpush.msra.mxu2 %v104_v16 }
  0x18   :  { %168 = vmatpush.msra.mxu3 %v141_v34 }
  0x19   :  { %128 = vmatpush.msra.mxu2 %v103_v17 }
  0x1a   :  { %169 = vmatpush.msra.mxu3 %v140_v35 }
  0x1b   :  { %129 = vmatpush.msra.mxu2 %v102_v18 }
  0x1c   :  { %170 = vmatpush.msra.mxu3 %v139_v36 }
  0x1d   :  { %130 = vmatpush.msra.mxu2 %v101_v19 }
  0x1f   :  { %131 = vmatpush.msra.mxu2 %v100_v20 }
  0x21   :  { %132 = vmatpush.msra.mxu2 %v99_v21 }
  0x23   :  { %133 = vmatpush.msra.mxu2 %v98_v22 }
  0x80   :  { %v65_v28 = vpop.f32.mrf.mxu0 }
  0x86   :  { %v89_v30 = vpop.f32.mrf.mxu1 }
  0x87   :  { %v90_v31 = vadd.f32 %v89_v30, %v65_v28 }
  0x89   :  { %v96_v32 = vadd.f32 %v199_v29, %v90_v31 }
  0x8b   :  { %v97_v33 = vmax.f32 %v96_v32, 0.0 }
  0x8d   :  { %134 = vmatmul.f32.vlgmr.msra.gmra.mxu2 %v97_v33 }
 0x110   :  { %v135_v38 = vpop.f32.mrf.mxu2 }
 0x111   :  { %v136_v39 = vadd.f32 %v200_v37, %v135_v38 }
 0x113   :  { %v138_v40 = vmax.f32 %v136_v39, 0.0 }
 0x115   :  { %197 = vmatmul.msk.f32.vlgmr.msra.gmra.mxu3 %vm151_vm3, %v138_v40 }
 0x198   :  { %v172_v42 = vpop.f32.mrf.mxu3 }
 0x199   :  { %v173_v43 = vadd.f32 %v201_v41, %v172_v42 }
 0x19b   :  { %202 = vtanh.f32 %v173_v43 }
 0x1a1   :  { %v203_v44 = vpop.eup %202 }
 0x1a2   :  { %177 = vst.msk [vmem:[#allocation2] sm:$0xff] %vm176_vm4, %v203_v44 }
 0x1a3   :  { %188 = dma.vmem_to_hbm [thread:$0]  %s184_s24, 128, %s186_s26, [#allocation3]  }
 0x1a4   :  { %228 = dma.done.wait [#allocation3], 128  }
 0x1a5   :  { %229 = vsyncadd [#allocation3], 4294967168 }
 0x1a6   :  { %193 = vsyncpa [#allocation3], 1 }

</bundles_post_ra>
